<compile_context>
chip_gen: v6e
topology: v6e:2x2x1
jax: 0.10.0
libtpu: 0.0.40
codegen_flags: <defaults>
</compile_context>

<pallas_src>
import jax
import jax.numpy as jnp
from jax.experimental import pallas as pl
from jax.experimental.pallas import tpu as pltpu


# --------------------------------------------------------------------------
# Single-step kernel: one fused MXU push for all independent projections.
# --------------------------------------------------------------------------
def gru_cell_kernel(xh_ref, bp_ref, u_ref, out_ref):
    H = u_ref.shape[0]
    xh = xh_ref[...]                       # (B, in+H)
    h = xh[:, xh.shape[-1] - H:]           # (B, H)  lane slice of the loaded tile

    # One MXU call: [x@Wz + h@Uz | x@Wr + h@Ur | x@W]
    g = jnp.dot(xh, bp_ref[...], preferred_element_type=jnp.float32)

    z_t = jax.nn.sigmoid(g[:, :H])
    r_t = jax.nn.sigmoid(g[:, H:2 * H])

    # Candidate: reset applied pre-matmul, matching `(r_t * h) @ U + x @ W`.
    h_t = jnp.tanh(
        jnp.dot(r_t * h, u_ref[...], preferred_element_type=jnp.float32)
        + g[:, 2 * H:]
    )

    # h_new = z*h + (1-z)*h_t  ==  h + (1-z)*(h_t - h)
    out_ref[...] = h + (1.0 - z_t) * (h_t - h)


def gru_cell(x, h, b_packed, u):
    """Single GRU step. Mirrors GRUCell.forward(x, h)."""
    batch, hidden = h.shape
    xh = jnp.concatenate([x, h], axis=-1)          # (B, in+H), one cheap XLA op
    vmem = pl.BlockSpec(memory_space=pltpu.VMEM)
    return pl.pallas_call(
        gru_cell_kernel,
        out_shape=jax.ShapeDtypeStruct((batch, hidden), jnp.float32),
        in_specs=[vmem, vmem, vmem],
        out_specs=vmem,
    )(xh, b_packed, u)


# --------------------------------------------------------------------------
# Sequence kernel: time loop inside the pallas_call, weights VMEM-resident,
# h carried in VMEM scratch, x-projection hoisted out of the recurrent loop.
# --------------------------------------------------------------------------
def gru_seq_kernel(gx_ref, h0_ref, uzr_ref, u_ref, hseq_ref, h_carry):
    t = pl.program_id(0)
    H = u_ref.shape[0]

    @pl.when(t == 0)
    def _():
        h_carry[...] = h0_ref[...]

    h = h_carry[...]                       # (B, H) carried hidden state
    gx = gx_ref[0]                         # (B, 3H) precomputed x-projection

    # Only the recurrent (h-dependent) matmuls stay inside the loop.
    gh = jnp.dot(h, uzr_ref[...], preferred_element_type=jnp.float32)  # (B, 2H)
    zr = gx[:, :2 * H] + gh
    z_t = jax.nn.sigmoid(zr[:, :H])
    r_t = jax.nn.sigmoid(zr[:, H:])

    h_t = jnp.tanh(
        jnp.dot(r_t * h, u_ref[...], preferred_element_type=jnp.float32)
        + gx[:, 2 * H:]
    )

    h_new = h + (1.0 - z_t) * (h_t - h)
    h_carry[...] = h_new
    hseq_ref[0] = h_new


def gru_sequence(xs, h0, w_cat, u_zr, u):
    """Apply the GRU cell over a (T, B, input_size) sequence in one kernel."""
    T, batch, in_size = xs.shape
    H = h0.shape[-1]

    # Hoist the non-recurrent x-side projection: one dense, MXU-efficient
    # matmul instead of T tiny ones inside the loop.
    gx = (xs.reshape(T * batch, in_size) @ w_cat).reshape(T, batch, 3 * H)

    return pl.pallas_call(
        gru_seq_kernel,
        out_shape=jax.ShapeDtypeStruct((T, batch, H), jnp.float32),
        grid=(T,),
        in_specs=[
            pl.BlockSpec((1, batch, 3 * H), lambda t: (t, 0, 0)),   # streamed
            pl.BlockSpec((batch, H), lambda t: (0, 0)),             # DMA'd once
            pl.BlockSpec((H, 2 * H), lambda t: (0, 0)),             # VMEM-resident
            pl.BlockSpec((H, H), lambda t: (0, 0)),                 # VMEM-resident
        ],
        out_specs=pl.BlockSpec((1, batch, H), lambda t: (t, 0, 0)),
        scratch_shapes=[pltpu.VMEM((batch, H), jnp.float32)],        # h carry
        compiler_params=pltpu.CompilerParams(
            dimension_semantics=("arbitrary",)),                     # time is sequential
    )(gx, h0, u_zr, u)


# --------------------------------------------------------------------------
# Host-side, one-time weight packing (do NOT re-trace this per step).
# --------------------------------------------------------------------------
def fuse_gru_weights(w_z, u_z, w_r, u_r, w, u):
    H = u.shape[0]
    w_cat = jnp.concatenate([w_z, w_r, w], axis=1)                    # (in, 3H)
    u_zr = jnp.concatenate([u_z, u_r], axis=1)                        # (H, 2H)
    u_pad = jnp.concatenate([u_zr, jnp.zeros((H, H), u.dtype)], axis=1)  # (H, 3H)
    b_packed = jnp.concatenate([w_cat, u_pad], axis=0)                # (in+H, 3H)
    return w_cat, u_zr, b_packed, u


def gru_cell_ref(x, h, w_z, u_z, w_r, u_r, w, u):
    z_t = jax.nn.sigmoid(x @ w_z + h @ u_z)
    r_t = jax.nn.sigmoid(x @ w_r + h @ u_r)
    h_t = jnp.tanh((r_t * h) @ u + x @ w)
    return z_t * h + (1.0 - z_t) * h_t


if __name__ == "__main__":
    input_size = 16
    hidden_size = 32
    batch = 8
    seq_len = 8

    key = jax.random.PRNGKey(0)
    keys = jax.random.split(key, 9)

    # Deterministic synthetic parameters (same shapes as the nn.Module).
    w_z = jax.random.normal(keys[0], (input_size, hidden_size), jnp.float32)
    u_z = jax.random.normal(keys[1], (hidden_size, hidden_size), jnp.float32)
    w_r = jax.random.normal(keys[2], (input_size, hidden_size), jnp.float32)
    u_r = jax.random.normal(keys[3], (hidden_size, hidden_size), jnp.float32)
    u   = jax.random.normal(keys[4], (hidden_size, hidden_size), jnp.float32)
    w   = jax.random.normal(keys[5], (input_size, hidden_size), jnp.float32)

    x = jax.random.normal(keys[6], (batch, input_size), jnp.float32)
    h = jax.random.normal(keys[7], (batch, hidden_size), jnp.float32)
    xs = jax.random.normal(keys[8], (seq_len, batch, input_size), jnp.float32)

    # Pack weights once, outside the kernels.
    w_cat, u_zr, b_packed, u_f = fuse_gru_weights(w_z, u_z, w_r, u_r, w, u)
    w_cat, u_zr, b_packed, u_f = jax.block_until_ready(
        (w_cat, u_zr, b_packed, u_f))

    # ---- single step (mirrors GRUCell.forward exactly) ----
    out = gru_cell(x, h, b_packed, u_f)
    out = jax.block_until_ready(out)
    ref = gru_cell_ref(x, h, w_z, u_z, w_r, u_r, w, u)
    assert out.shape == (batch, hidden_size)
    assert jnp.allclose(out, ref, atol=1e-5, rtol=1e-5), "single-step mismatch"

    # ---- sequence (same cell applied over T steps inside one kernel) ----
    hs = gru_sequence(xs, h, w_cat, u_zr, u_f)
    hs = jax.block_until_ready(hs)
    h_loop = h
    refs = []
    for t in range(seq_len):
        h_loop = gru_cell_ref(xs[t], h_loop, w_z, u_z, w_r, u_r, w, u)
        refs.append(h_loop)
    refs = jnp.stack(refs)
    assert hs.shape == (seq_len, batch, hidden_size)
    assert jnp.allclose(hs, refs, atol=1e-4, rtol=1e-4), "sequence mismatch"

    print("KERNEL_OK")
</pallas_src>

<mosaic_0001>
module attributes {stable_mosaic.version = 11 : i64} {
  func.func @gru_cell_kernel(%arg0: memref<8x48xf32, #tpu.memory_space<vmem>>, %arg1: memref<48x96xf32, #tpu.memory_space<vmem>>, %arg2: memref<32x32xf32, #tpu.memory_space<vmem>>, %arg3: memref<8x32xf32, #tpu.memory_space<vmem>>) attributes {dimension_semantics = [], scalar_prefetch = 0 : i64, scratch_operands = 0 : i64, tpu.core_type = #tpu.core_type<tc>} {
    %c0 = arith.constant 0 : index
    %c0_0 = arith.constant 0 : index
    %0 = vector.load %arg0[%c0, %c0_0] : memref<8x48xf32, #tpu.memory_space<vmem>>, vector<8x48xf32>
    %1 = vector.extract_strided_slice %0 {offsets = [0, 16], sizes = [8, 32], strides = [1, 1]} : vector<8x48xf32> to vector<8x32xf32>
    %c0_1 = arith.constant 0 : index
    %c0_2 = arith.constant 0 : index
    %2 = vector.load %arg1[%c0_1, %c0_2] : memref<48x96xf32, #tpu.memory_space<vmem>>, vector<48x96xf32>
    %cst = arith.constant dense<0.000000e+00> : vector<8x96xf32>
    %3 = tpu.matmul %0, %2, %cst {dimension_numbers = #tpu.dot_dimension_numbers<[1], [0], [0], [1], [0, 0, 1, 1], [], []>} : vector<8x48xf32>, vector<48x96xf32>, vector<8x96xf32> -> vector<8x96xf32>
    %4 = vector.extract_strided_slice %3 {offsets = [0, 0], sizes = [8, 32], strides = [1, 1]} : vector<8x96xf32> to vector<8x32xf32>
    %5 = arith.negf %4 : vector<8x32xf32>
    %6 = math.exp %5 : vector<8x32xf32>
    %cst_3 = arith.constant 1.000000e+00 : f32
    %7 = vector.broadcast %cst_3 : f32 to vector<8x32xf32>
    %8 = arith.addf %7, %6 : vector<8x32xf32>
    %9 = arith.divf %7, %8 : vector<8x32xf32>
    %10 = vector.extract_strided_slice %3 {offsets = [0, 32], sizes = [8, 32], strides = [1, 1]} : vector<8x96xf32> to vector<8x32xf32>
    %11 = arith.negf %10 : vector<8x32xf32>
    %12 = math.exp %11 : vector<8x32xf32>
    %cst_4 = arith.constant 1.000000e+00 : f32
    %13 = vector.broadcast %cst_4 : f32 to vector<8x32xf32>
    %14 = arith.addf %13, %12 : vector<8x32xf32>
    %15 = arith.divf %13, %14 : vector<8x32xf32>
    %16 = arith.mulf %15, %1 : vector<8x32xf32>
    %c0_5 = arith.constant 0 : index
    %c0_6 = arith.constant 0 : index
    %17 = vector.load %arg2[%c0_5, %c0_6] : memref<32x32xf32, #tpu.memory_space<vmem>>, vector<32x32xf32>
    %cst_7 = arith.constant dense<0.000000e+00> : vector<8x32xf32>
    %18 = tpu.matmul %16, %17, %cst_7 {dimension_numbers = #tpu.dot_dimension_numbers<[1], [0], [0], [1], [0, 0, 1, 1], [], []>} : vector<8x32xf32>, vector<32x32xf32>, vector<8x32xf32> -> vector<8x32xf32>
    %19 = vector.extract_strided_slice %3 {offsets = [0, 64], sizes = [8, 32], strides = [1, 1]} : vector<8x96xf32> to vector<8x32xf32>
    %20 = arith.addf %18, %19 : vector<8x32xf32>
    %21 = math.tanh %20 : vector<8x32xf32>
    %cst_8 = arith.constant 1.000000e+00 : f32
    %22 = vector.broadcast %cst_8 : f32 to vector<8x32xf32>
    %23 = arith.subf %22, %9 : vector<8x32xf32>
    %24 = arith.subf %21, %1 : vector<8x32xf32>
    %25 = arith.mulf %23, %24 : vector<8x32xf32>
    %26 = arith.addf %1, %25 : vector<8x32xf32>
    %c0_9 = arith.constant 0 : index
    %c0_10 = arith.constant 0 : index
    %27 = vector.load %arg3[%c0_9, %c0_10] : memref<8x32xf32, #tpu.memory_space<vmem>>, vector<8x32xf32>
    tpu.vector_store %arg3[%c0_9, %c0_10], %26 {strides = array<i32>} : memref<8x32xf32, #tpu.memory_space<vmem>>, vector<8x32xf32>,
    return
  }
}

</mosaic_0001>

<bundles_post_ra>
// kernel: tpu_custom_call.1
= control target key start
LH: loop header
LB: loop body
LE: loop exit
PB: predicated region body
PF: predicated region fallthrough
CT: control target
= control target key end

     0   :  { %8 = vsyncpa [#allocation3], 0  ;;  %s455_s0 = inlined_call_operand.hbm [shape: f32[8,48], index: 0, kind: input, shape index: {}]   ;;  %s456_s1 = inlined_call_operand.hbm [shape: f32[48,96], index: 1, kind: input, shape index: {}]   ;;  %s457_s2 = inlined_call_operand.hbm [shape: f32[32,32], index: 2, kind: input, shape index: {}]   ;;  %s458_s3 = inlined_call_operand.hbm [shape: f32[8,32], index: 3, kind: output, shape index: {}]  }
   0x1   :  { %9 = vsyncpa [#allocation6], 0 }
   0x2   :  { %10 = vsyncpa [#allocation4], 0  ;;  %s407_s12 = smov [#allocation5]  }
   0x3   :  { %s26_s13 = sshll.u32 %s407_s12, 4  ;;  %s27_s13 = int_to_ptr.vmem [resolvable:$true] %s26_s13 }
   0x4   :  { %s329_s14 = scalar_lea.vmem %s27_s13, 768  ;;  %p334_p1 = scmp.lt.s32.totalorder %s27_s13, %s27_s13 }
   0x5   :  { %p330_p0 = scmp.ne.s32.totalorder %s27_s13, %s329_s14  ;;  %p335_p2 = scmp.lt.s32.totalorder %s329_s14, %s329_s14 }
   0x7   :  { %p336_p3 = por %p335_p2, %p334_p1 }
   0x9   :  { %p337_p4 = pnand %p336_p3, %p330_p0 }
   0xb   :  { %340 = shalt.err (!%p337_p4)
}
   0xc   :  { %s408_s15 = smov 128   ;;  %s409_s16 = smov 8  }
   0xd   :  { %32 = dma.hbm_to_vmem [thread:$0]  %s456_s1, 768, %s27_s13, [#allocation6], %s408_s15, %s408_s15, %s409_s16  }
   0xe   :  { %s410_s19 = smov [#allocation2]   ;;  %s411_s21 = smov [#allocation7]  }
   0xf   :  { %s17_s20 = sshll.u32 %s410_s19, 4  ;;  %s38_s22 = sshll.u32 %s411_s21, 4  ;;  %s18_s20 = int_to_ptr.vmem [resolvable:$true] %s17_s20  ;;  %s39_s22 = int_to_ptr.vmem [resolvable:$true] %s38_s22 }
  0x10   :  { %s349_s23 = scalar_lea.vmem %s18_s20, 128  ;;  %p354_p6 = scmp.lt.s32.totalorder %s18_s20, %s18_s20 }
  0x11   :  { %p350_p5 = scmp.ne.s32.totalorder %s18_s20, %s349_s23  ;;  %p355_p7 = scmp.lt.s32.totalorder %s349_s23, %s349_s23 }
  0x13   :  { %p356_p8 = por %p355_p7, %p354_p6 }
  0x15   :  { %p357_p9 = pnand %p356_p8, %p350_p5 }
  0x17   :  { %360 = shalt.err (!%p357_p9)
}
  0x18   :  { %20 = dma.hbm_to_vmem [thread:$0]  %s455_s0, 128, %s18_s20, [#allocation3]  }
  0x19   :  { %s369_s26 = scalar_lea.vmem %s39_s22, 512  ;;  %p374_p11 = scmp.lt.s32.totalorder %s39_s22, %s39_s22 }
  0x1a   :  { %p370_p10 = scmp.ne.s32.totalorder %s39_s22, %s369_s26  ;;  %p375_p12 = scmp.lt.s32.totalorder %s369_s26, %s369_s26 }
  0x1c   :  { %p376_p13 = por %p375_p12, %p374_p11 }
  0x1e   :  { %p377_p0 = pnand %p376_p13, %p370_p10 }
  0x20   :  { %380 = shalt.err (!%p377_p0)
}
  0x21   :  { %44 = dma.hbm_to_vmem [thread:$0]  %s457_s2, 512, %s39_s22, [#allocation6], %s408_s15, %s408_s15, %s409_s16  }
  0x22   :  { %401 = dma.done.wait [#allocation3], 128  }
  0x23   :  { %402 = vsyncadd [#allocation3], 4294967168 }
  0x24   :  { %403 = dma.done.wait [#allocation6], 1280  }
  0x25   :  { %404 = vsyncadd [#allocation6], 4294966016  ;;  %v412_v0 = vmov 0.0   ;;  %vm413_vm0 = vmmov 0   ;;  %v60_v1 = vld [vmem:[#allocation5 + $0x28] sm:$0xff]  ;;  %v59_v2 = vld [vmem:[#allocation5 + $0x20] sm:$0xff] }
  0x26   :  { %277 = vmatprep.subr.mxu0 %v412_v0  ;;  %289 = vmatprep.mubr.msk.f32.mxu0 %vm413_vm0, %v412_v0  ;;  %v58_v3 = vld [vmem:[#allocation5 + $0x18] sm:$0xff]  ;;  %s414_s0 = smov 16   ;;  %v57_v5 = vld [vmem:[#allocation5 + $0x10] sm:$0xff]  ;;  %v56_v6 = vld [vmem:[#allocation5 + $0x8] sm:$0xff]  ;;  %vm61_vm1 = vcmask 392192   ;;  %s415_s2 = smov 64  }
  0x27   :  { %292 = vmatprep.subr.mxu1 %v412_v0  ;;  %300 = vmatprep.mubr.msk.f32.mxu1 %vm413_vm0, %v412_v0  ;;  %v54_v4 = vld [vmem:[#allocation2] sm:$0xff]  ;;  %v55_v7 = vld [vmem:[#allocation5] sm:$0xff]  ;;  %v148_v8 = vld [vmem:[#allocation7 + $0x18] sm:$0xff]  ;;  %s416_s28 = smov 112   ;;  %s417_s29 = smov 96   ;;  %vm156_vm2 = vcmask 261120  }
  0x28   :  { %278 = vmatpush3.msra.mxu0 %v60_v1  ;;  %141 = vrot.lane.b32.xlu0 %v54_v4, %s414_s0  ;;  %v147_v9 = vld [vmem:[#allocation7 + $0x10] sm:$0xff]  ;;  %v146_v10 = vld [vmem:[#allocation7 + $0x8] sm:$0xff]  ;;  %v145_v11 = vld [vmem:[#allocation7] sm:$0xff]  ;;  %s418_s30 = smov [#allocation8]  }
  0x29   :  { %279 = vmatprep.subr.mxu0 %v412_v0  ;;  %293 = vmatpush3.msra.mxu1 %v148_v8  ;;  %s252_s4 = sshll.u32 %s418_s30, 4  ;;  %s253_s4 = int_to_ptr.vmem [resolvable:$true] %s252_s4 }
  0x2a   :  { %280 = vmatpush3.msra.mxu0 %v59_v2  ;;  %294 = vmatprep.subr.mxu1 %v412_v0  ;;  %s381_s5 = scalar_lea.vmem %s253_s4, 128  ;;  %p386_p2 = scmp.lt.s32.totalorder %s253_s4, %s253_s4 }
  0x2b   :  { %281 = vmatprep.subr.mxu0 %v412_v0  ;;  %295 = vmatpush3.msra.mxu1 %v147_v9  ;;  %p382_p1 = scmp.ne.s32.totalorder %s253_s4, %s381_s5  ;;  %p387_p3 = scmp.lt.s32.totalorder %s381_s5, %s381_s5 }
  0x2c   :  { %282 = vmatpush3.msra.mxu0 %v58_v3  ;;  %296 = vmatprep.subr.mxu1 %v412_v0 }
  0x2d   :  { %283 = vmatprep.subr.mxu0 %v412_v0  ;;  %297 = vmatpush3.msra.mxu1 %v146_v10  ;;  %p388_p4 = por %p387_p3, %p386_p2 }
  0x2e   :  { %284 = vmatpush3.msra.mxu0 %v57_v5  ;;  %298 = vmatprep.subr.mxu1 %v412_v0 }
  0x2f   :  { %285 = vmatprep.subr.mxu0 %v412_v0  ;;  %299 = vmatpush3.msra.mxu1 %v145_v11  ;;  %p389_p5 = pnand %p388_p4, %p382_p1 }
  0x30   :  { %286 = vmatpush3.msra.mxu0 %v56_v6 }
  0x31   :  { %287 = vmatprep.subr.mxu0 %v412_v0 }
  0x32   :  { %288 = vmatpush3.msra.mxu0 %v55_v7 }
  0x33   :  { %290 = vmatmul.mubr.msk.f32.vlgmr.msra.gmra.mxu0 %vm61_vm1, %v54_v4 }
  0x9a   :  { %v142_v17 = vpop.permute.xlu0 %141 }
  0xf3   :  { %v131_v12 = vpop.f32.mrf.mxu0 }
  0xf4   :  { %v263_v13 = vmul.f32 -1.442695, %v131_v12  ;;  %153 = vrot.lane.b32.xlu1 %v131_v12, %s415_s2 }
  0xf5   :  { %v291_v14 = vpop.f32.mrf.mxu0 }
  0xf6   :  { %315 = vpow2.f32 %v263_v13 }
  0xf8   :  { %231 = vrot.lane.b32.xlu1 %v54_v4, %s416_s28 }
 0x103   :  { %v316_v15 = vpop.eup %315 }
 0x104   :  { %v138_v16 = vadd.f32 1.0, %v316_v15 }
 0x106   :  { %317 = vrcp.f32 %v138_v16 }
 0x113   :  { %v318_v18 = vpop.eup %317 }
 0x114   :  { %v144_v19 = vmul.f32 %v318_v18, %v142_v17  ;;  %v230_v27 = vsub.f32 1.0, %v318_v18 }
 0x116   :  { %150 = vrot.lane.b32.xlu0 %v144_v19, %s417_s29 }
 0x166   :  { %v154_v21 = vpop.permute.xlu1 %153 }
 0x16a   :  { %v232_v25 = vpop.permute.xlu1 %231 }
 0x188   :  { %v151_v20 = vpop.permute.xlu0 %150 }
 0x189   :  { %301 = vmatmul.mubr.msk.f32.vlgmr.msra.gmra.mxu1 %vm156_vm2, %v151_v20 }
 0x249   :  { %v225_v22 = vpop.f32.mrf.mxu1 }
 0x24a   :  { %v226_v23 = vadd.f32 %v225_v22, %v154_v21 }
 0x24b   :  { %v302_v24 = vpop.f32.mrf.mxu1 }
 0x24c   :  { %319 = vtanh.f32 %v226_v23 }
 0x259   :  { %v320_v26 = vpop.eup %319 }
 0x25a   :  { %v234_v28 = vsub.f32 %v320_v26, %v232_v25 }
 0x25c   :  { %v235_v29 = vmul.f32 %v234_v28, %v230_v27 }
 0x25e   :  { %237 = vrot.lane.b32.xlu0 %v235_v29, %s414_s0 }
 0x2d0   :  { %v238_v30 = vpop.permute.xlu0 %237 }
 0x2d1   :  { %v240_v31 = vadd.f32 %v238_v30, %v54_v4 }
 0x2d3   :  { %242 = vrot.lane.b32.xlu1 %v240_v31, %s416_s28 }
 0x345   :  { %v243_v32 = vpop.permute.xlu1 %242 }
 0x346   :  { %245 = vst.msk [vmem:[#allocation8] sm:$0xff] %vm156_vm2, %v243_v32 }
 0x347   :  { %392 = shalt.err (!%p389_p5)
}
 0x348   :  { %255 = dma.vmem_to_hbm [thread:$0]  %s253_s4, 128, %s458_s3, [#allocation4]  }
 0x349   :  { %405 = dma.done.wait [#allocation4], 128  }
 0x34a   :  { %406 = vsyncadd [#allocation4], 4294967168 }
 0x34b   :  { %259 = vsyncpa [#allocation3], 1 }
 0x34c   :  { %260 = vsyncpa [#allocation6], 1 }
 0x34d   :  { %261 = vsyncpa [#allocation4], 1 }

</bundles_post_ra>
